<compile_context>
chip_gen: v7x
topology: tpu7x:2x2x1
jax: 0.10.0
libtpu: 0.0.40
codegen_flags: <defaults>
</compile_context>

<pallas_src>
import numpy as np

import jax
import jax.numpy as jnp
from jax import lax
from jax.experimental import pallas as pl
from jax.experimental.pallas import tpu as pltpu


def _squared_boundaries(min_bin, max_bin, n_bins):
    # torch.linspace(min_bin, max_bin, n_bins - 1) ** 2, in float32.
    return np.linspace(min_bin, max_bin, n_bins - 1, dtype=np.float32) ** 2


_UNROLL_MAX_BINS = 32   # fully unroll the picked loop up to this many bins


def _make_kernel(boundaries, n_bins):
    bnd = [float(v) for v in boundaries]   # baked consts for the unrolled path
    nb = n_bins

    def kernel(hvr_ref, hvc_ref,            # scalar prefetch: row/col validity flags
               projr_ref,                   # [1, TR, nb]  proj rows
               projc_ref,                   # [1, nb, TC]  proj cols (transposed)
               car_ref,                     # [1, TR, 3]   Calpha rows
               cac_ref,                     # [1, 3, TC]   Calpha cols (transposed)
               vr_ref,                      # [1, TR, 1]   valid rows (float)
               vc_ref,                      # [1, 1, TC]   valid cols (float)
               bnd_ref,                     # [nb-1] f32 in SMEM (fori path only)
               out_ref):                    # [1, 1, 8, 128] partial-sum slab
        b = pl.program_id(0)
        r = pl.program_id(1)
        c = pl.program_id(2)
        R = pl.num_programs(1)
        C = pl.num_programs(2)

        @pl.when(c == 0)
        def _init():
            out_ref[...] = jnp.zeros(out_ref.shape, jnp.float32)

        has_work = jnp.logical_and(hvr_ref[b * R + r] > 0,
                                   hvc_ref[b * C + c] > 0)

        @pl.when(has_work)
        def _compute():
            proj_r = projr_ref[0]           # [TR, nb]
            proj_c = projc_ref[0]           # [nb, TC]
            ca_r = car_ref[0]               # [TR, 3]
            ca_c = cac_ref[0]               # [3, TC]
            vr = vr_ref[0]                  # [TR, 1]
            vc = vc_ref[0]                  # [1, TC]

            TR = proj_r.shape[0]
            TC = proj_c.shape[1]

            # Pairwise squared Calpha distances: 3 unrolled lane-dense FMAs.
            dists = jnp.zeros((TR, TC), jnp.float32)
            for ax in range(3):
                d = ca_r[:, ax:ax + 1] - ca_c[ax][None, :]
                dists = dists + d * d

            # logsumexp over bins on the MXU:
            #   m_hat[i,j] = rowmax_k proj_r[i,k] + colmax_k proj_c[k,j]
            #   s[i,j]     = sum_k exp(l_k - m_hat) = (er @ ec)[i,j]
            row_max = jnp.max(proj_r, axis=1, keepdims=True)     # [TR, 1]
            col_max = jnp.max(proj_c, axis=0, keepdims=True)     # [1, TC]
            er = jnp.exp(proj_r - row_max)                       # [TR, nb]
            ec = jnp.exp(proj_c - col_max)                       # [nb, TC]
            s = jnp.dot(er, ec, preferred_element_type=jnp.float32)   # [TR, TC]

            # True-bin ("picked") logit via running select over ordered bins.
            picked = proj_r[:, 0:1] + proj_c[0][None, :]
            if nb <= _UNROLL_MAX_BINS:
                for k in range(1, nb):
                    lk = proj_r[:, k:k + 1] + proj_c[k][None, :]
                    picked = jnp.where(dists > bnd[k - 1], lk, picked)
            else:
                def body(k, acc):
                    lk = (projr_ref[0, :, pl.ds(k, 1)]
                          + projc_ref[0, pl.ds(k, 1), :])
                    return jnp.where(dists > bnd_ref[k - 1], lk, acc)
                picked = lax.fori_loop(1, nb, body, picked, unroll=4)

            # Per-pair cross entropy (m_hat >= true max, s floored so log is
            # never -inf even under extreme logit ranges), masked partial sum.
            ce = (row_max + col_max) + jnp.log(jnp.maximum(s, 1e-30)) - picked
            partial = jnp.sum(ce * (vr * vc))
            out_ref[...] = out_ref[...] + partial

    return kernel


def _pick_tiles(L, plane_budget_bytes=12 << 20):
    """VMEM-aware tiles: ~6 f32 planes of [row_tile, col_tile] under budget."""
    col_tile = L
    if L % 128 == 0:
        for t in (512, 256, 128):
            if L % t == 0:
                col_tile = t
                break
    row_tile = L
    for t in (256, 128, 64, 32, 16, 8):
        if L % t == 0 and 6 * 4 * t * col_tile <= plane_budget_bytes:
            row_tile = t
            break
    return row_tile, col_tile


def ca_distogram_loss_pallas(x, A, padding_mask, W, bias,
                             min_bin, max_bin, n_bins,
                             row_tile=None, col_tile=None):
    B, L, D = x.shape
    nb = n_bins
    boundaries = _squared_boundaries(min_bin, max_bin, nb)

    auto_r, auto_c = _pick_tiles(L)
    if row_tile is None:
        row_tile = auto_r
    if col_tile is None:
        col_tile = auto_c
    assert L % row_tile == 0 and L % col_tile == 0
    R = L // row_tile
    C = L // col_tile

    # Hoisted projection (exact folding of the symmetrised pairwise linear):
    #   Linear([x_i, x_j]) + Linear([x_j, x_i]) = proj[i] + proj[j],
    #   proj = x @ (W1 + W2)^T + b.
    W1 = W[:, :D].astype(jnp.float32)
    W2 = W[:, D:].astype(jnp.float32)
    w_sum_t = jnp.transpose(W1 + W2)                              # [D, nb]
    proj = (jnp.einsum("bld,dn->bln", x.astype(jnp.float32), w_sum_t)
            + bias.astype(jnp.float32)[None, None, :])            # [B, L, nb]
    proj_t = jnp.transpose(proj, (0, 2, 1))                       # [B, nb, L]

    ca = A[:, 1, :, :].astype(jnp.float32)                        # [B, L, 3]
    ca_t = jnp.transpose(ca, (0, 2, 1))                           # [B, 3, L]

    valid = 1.0 - padding_mask.astype(jnp.float32)                # [B, L]
    vr = valid.reshape(B, L, 1)
    vc = valid.reshape(B, 1, L)

    # Per-(batch, row-block) / (batch, col-block) "has any valid" flags.
    hvr = (valid.reshape(B, R, row_tile).sum(axis=-1) > 0)
    hvr = hvr.astype(jnp.int32).reshape(B * R)
    hvc = (valid.reshape(B, C, col_tile).sum(axis=-1) > 0)
    hvc = hvc.astype(jnp.int32).reshape(B * C)

    bnd_arr = jnp.asarray(boundaries, dtype=jnp.float32)          # [nb-1]

    kernel = _make_kernel(boundaries, nb)

    # Explicit VMEM budget: live planes + double-buffered input blocks.
    plane_bytes = 6 * 4 * row_tile * col_tile
    blk_bytes = 2 * 2 * 4 * (row_tile * (max(nb, 128) + 256)
                             + col_tile * (nb + 16))
    vmem_limit = int(min(48 << 20, max(16 << 20, 2 * (plane_bytes + blk_bytes))))

    cost = pl.CostEstimate(
        flops=int(B * L * L * (5 * nb + 20)),
        transcendentals=int(B * L * L + 2 * B * L * nb),
        bytes_accessed=int(4 * (2 * proj.size + 2 * ca.size + vr.size + vc.size
                                + B * R * 8 * 128)),
    )

    grid_spec = pltpu.PrefetchScalarGridSpec(
        num_scalar_prefetch=2,
        grid=(B, R, C),
        in_specs=[
            pl.BlockSpec((1, row_tile, nb), lambda b, r, c, hr, hc: (b, r, 0)),
            pl.BlockSpec((1, nb, col_tile), lambda b, r, c, hr, hc: (b, 0, c)),
            pl.BlockSpec((1, row_tile, 3), lambda b, r, c, hr, hc: (b, r, 0)),
            pl.BlockSpec((1, 3, col_tile), lambda b, r, c, hr, hc: (b, 0, c)),
            pl.BlockSpec((1, row_tile, 1), lambda b, r, c, hr, hc: (b, r, 0)),
            pl.BlockSpec((1, 1, col_tile), lambda b, r, c, hr, hc: (b, 0, c)),
            pl.BlockSpec(memory_space=pltpu.MemorySpace.SMEM),     # boundaries
        ],
        out_specs=pl.BlockSpec((1, 1, 8, 128),
                               lambda b, r, c, hr, hc: (b, r, 0, 0)),
    )

    out = pl.pallas_call(
        kernel,
        out_shape=jax.ShapeDtypeStruct((B, R, 8, 128), jnp.float32),
        grid_spec=grid_spec,
        compiler_params=pltpu.CompilerParams(
            dimension_semantics=("parallel", "parallel", "arbitrary"),
            vmem_limit_bytes=vmem_limit),
        cost_estimate=cost,
    )(hvr, hvc, proj, proj_t, ca, ca_t, vr, vc, bnd_arr)

    partial = out[:, :, 0, 0]                    # [B, R] per-row-block CE sums
    num = jnp.sum(partial, axis=1)               # [B]
    valid_count = jnp.sum(valid, axis=1)         # [B]
    denom = 1e-6 + valid_count * valid_count     # == 1e-6 + sum(dists_mask)
    return jnp.mean(num / denom)


def reference_loss(x, A, padding_mask, W, bias, min_bin, max_bin, n_bins):
    """Plain-JAX mirror of the PyTorch forward (unsimplified pairwise linear)."""
    B, L, D = x.shape
    boundaries = jnp.asarray(_squared_boundaries(min_bin, max_bin, n_bins))
    xi = jnp.broadcast_to(x[:, :, None, :], (B, L, L, D))
    xj = jnp.broadcast_to(x[:, None, :, :], (B, L, L, D))
    pair = jnp.concatenate([xi, xj], axis=-1)                     # [B, L, L, 2D]
    logits = jnp.einsum("bijd,nd->bijn", pair, W) + bias
    logits = logits + jnp.swapaxes(logits, 1, 2)
    ca = A[:, 1, :, :]
    dists = jnp.sum((ca[:, :, None, :] - ca[:, None, :, :]) ** 2, axis=-1)
    true_bins = jnp.sum(dists[..., None] > boundaries, axis=-1)
    logp = jax.nn.log_softmax(logits, axis=-1)
    ce = -jnp.take_along_axis(logp, true_bins[..., None], axis=-1)[..., 0]
    dmask = (~(padding_mask[:, :, None] | padding_mask[:, None, :])).astype(jnp.float32)
    denom = 1e-6 + jnp.sum(dmask, axis=(-1, -2))
    loss = jnp.sum(ce * dmask, axis=-1) / denom[:, None]
    loss = jnp.sum(loss, axis=-1)
    return jnp.mean(loss)


if __name__ == "__main__":
    D = 32
    n_bins = 16
    min_bin, max_bin = 2.0, 20.0

    key = jax.random.PRNGKey(0)
    kx, kA, kW, kb = jax.random.split(key, 4)

    # Deterministic synthetic parameters for nn.Linear(2*D, n_bins).
    W = 0.02 * jax.random.normal(kW, (n_bins, 2 * D), dtype=jnp.float32)
    bias = 0.01 * jax.random.normal(kb, (n_bins,), dtype=jnp.float32)

    def build(B, L):
        x = jax.random.normal(kx, (B, L, D), dtype=jnp.float32)
        A = 5.0 * jax.random.normal(kA, (B, 3, L, 3), dtype=jnp.float32)
        # Second half of batch 1 is padding -> exercises block skipping.
        pm = jnp.zeros((B, L), dtype=bool).at[1, L // 2:].set(True)
        return x, A, pm

    # Case 1: small shapes (single column block; padded row-block skip).
    x, A, pm = build(2, 16)
    loss = jax.block_until_ready(
        ca_distogram_loss_pallas(x, A, pm, W, bias, min_bin, max_bin, n_bins,
                                 row_tile=8))
    ref = jax.block_until_ready(
        reference_loss(x, A, pm, W, bias, min_bin, max_bin, n_bins))
    assert jnp.allclose(loss, ref, rtol=1e-4, atol=1e-4), (float(loss), float(ref))

    # Case 2: multi row/col blocks -> exercises C-axis accumulation and
    # padded column-block skipping.
    x2, A2, pm2 = build(2, 256)
    loss2 = jax.block_until_ready(
        ca_distogram_loss_pallas(x2, A2, pm2, W, bias, min_bin, max_bin, n_bins,
                                 row_tile=64, col_tile=128))
    ref2 = jax.block_until_ready(
        reference_loss(x2, A2, pm2, W, bias, min_bin, max_bin, n_bins))
    assert jnp.allclose(loss2, ref2, rtol=1e-4, atol=1e-4), (float(loss2), float(ref2))

    print("KERNEL_OK")
</pallas_src>

<mosaic_0001>
module attributes {stable_mosaic.version = 11 : i64} {
  func.func @kernel(%arg0: i32, %arg1: i32, %arg2: i32, %arg3: memref<4xi32, #tpu.memory_space<smem>>, %arg4: memref<2xi32, #tpu.memory_space<smem>>, %arg5: memref<1x8x16xf32, #tpu.memory_space<vmem>>, %arg6: memref<1x16x16xf32, #tpu.memory_space<vmem>>, %arg7: memref<1x8x3xf32, #tpu.memory_space<vmem>>, %arg8: memref<1x3x16xf32, #tpu.memory_space<vmem>>, %arg9: memref<1x8x1xf32, #tpu.memory_space<vmem>>, %arg10: memref<1x1x16xf32, #tpu.memory_space<vmem>>, %arg11: memref<15xf32, #tpu.memory_space<smem>>, %arg12: memref<1x1x8x128xf32, #tpu.memory_space<vmem>>) attributes {dimension_semantics = [#tpu.dimension_semantics<parallel>, #tpu.dimension_semantics<parallel>, #tpu.dimension_semantics<arbitrary>], iteration_bounds = array<i64: 2, 2, 1>, scalar_prefetch = 2 : i64, scratch_operands = 0 : i64, tpu.core_type = #tpu.core_type<tc>, window_params = [{transform_indices = @transform_0, window_bounds = array<i64: 1, 8, 16>}, {transform_indices = @transform_1, window_bounds = array<i64: 1, 16, 16>}, {transform_indices = @transform_2, window_bounds = array<i64: 1, 8, 3>}, {transform_indices = @transform_3, window_bounds = array<i64: 1, 3, 16>}, {transform_indices = @transform_4, window_bounds = array<i64: 1, 8, 1>}, {transform_indices = @transform_5, window_bounds = array<i64: 1, 1, 16>}, {transform_indices = @transform_6, window_bounds = array<i64: 15>}, {transform_indices = @transform_7, window_bounds = array<i64: 1, 1, 8, 128>}]} {
    %c0_i32 = arith.constant 0 : i32
    %0 = arith.cmpi eq, %arg2, %c0_i32 : i32
    %1 = arith.extui %0 : i1 to i32
    %c0_i32_0 = arith.constant 0 : i32
    %2 = arith.cmpi ne, %1, %c0_i32_0 : i32
    scf.if %2 {
      %cst = arith.constant 0.000000e+00 : f32
      %16 = vector.broadcast %cst : f32 to vector<1x1x8x128xf32>
      %c0 = arith.constant 0 : index
      %c0_4 = arith.constant 0 : index
      %c0_5 = arith.constant 0 : index
      %c0_6 = arith.constant 0 : index
      %17 = vector.load %arg12[%c0, %c0_4, %c0_5, %c0_6] : memref<1x1x8x128xf32, #tpu.memory_space<vmem>>, vector<1x1x8x128xf32>
      tpu.vector_store %arg12[%c0, %c0_4, %c0_5, %c0_6], %16 {strides = array<i32>} : memref<1x1x8x128xf32, #tpu.memory_space<vmem>>, vector<1x1x8x128xf32>,
    } else {
    }
    %c2_i32 = arith.constant 2 : i32
    %3 = arith.muli %arg0, %c2_i32 : i32
    %4 = arith.addi %3, %arg1 : i32
    %5 = arith.index_cast %4 : i32 to index
    %6 = memref.load %arg3[%5] : memref<4xi32, #tpu.memory_space<smem>>
    %c0_i32_1 = arith.constant 0 : i32
    %7 = arith.cmpi sgt, %6, %c0_i32_1 : i32
    %c1_i32 = arith.constant 1 : i32
    %8 = arith.muli %arg0, %c1_i32 : i32
    %9 = arith.addi %8, %arg2 : i32
    %10 = arith.index_cast %9 : i32 to index
    %11 = memref.load %arg4[%10] : memref<2xi32, #tpu.memory_space<smem>>
    %c0_i32_2 = arith.constant 0 : i32
    %12 = arith.cmpi sgt, %11, %c0_i32_2 : i32
    %13 = arith.andi %7, %12 : i1
    %14 = arith.extui %13 : i1 to i32
    %c0_i32_3 = arith.constant 0 : i32
    %15 = arith.cmpi ne, %14, %c0_i32_3 : i32
    scf.if %15 {
      %c0 = arith.constant 0 : index
      %c0_4 = arith.constant 0 : index
      %c0_5 = arith.constant 0 : index
      %16 = vector.load %arg5[%c0, %c0_4, %c0_5] : memref<1x8x16xf32, #tpu.memory_space<vmem>>, vector<1x8x16xf32>
      %17 = vector.shape_cast %16 : vector<1x8x16xf32> to vector<8x16xf32>
      %c0_6 = arith.constant 0 : index
      %c0_7 = arith.constant 0 : index
      %c0_8 = arith.constant 0 : index
      %18 = vector.load %arg6[%c0_6, %c0_7, %c0_8] : memref<1x16x16xf32, #tpu.memory_space<vmem>>, vector<1x16x16xf32>
      %19 = vector.shape_cast %18 : vector<1x16x16xf32> to vector<16x16xf32>
      %c0_9 = arith.constant 0 : index
      %c0_10 = arith.constant 0 : index
      %c0_11 = arith.constant 0 : index
      %20 = vector.load %arg7[%c0_9, %c0_10, %c0_11] : memref<1x8x3xf32, #tpu.memory_space<vmem>>, vector<1x8x3xf32>
      %21 = vector.shape_cast %20 : vector<1x8x3xf32> to vector<8x3xf32>
      %c0_12 = arith.constant 0 : index
      %c0_13 = arith.constant 0 : index
      %c0_14 = arith.constant 0 : index
      %22 = vector.load %arg8[%c0_12, %c0_13, %c0_14] : memref<1x3x16xf32, #tpu.memory_space<vmem>>, vector<1x3x16xf32>
      %23 = vector.shape_cast %22 : vector<1x3x16xf32> to vector<3x16xf32>
      %c0_15 = arith.constant 0 : index
      %c0_16 = arith.constant 0 : index
      %c0_17 = arith.constant 0 : index
      %24 = vector.load %arg9[%c0_15, %c0_16, %c0_17] : memref<1x8x1xf32, #tpu.memory_space<vmem>>, vector<1x8x1xf32>
      %25 = vector.shape_cast %24 : vector<1x8x1xf32> to vector<8x1xf32>
      %c0_18 = arith.constant 0 : index
      %c0_19 = arith.constant 0 : index
      %c0_20 = arith.constant 0 : index
      %26 = vector.load %arg10[%c0_18, %c0_19, %c0_20] : memref<1x1x16xf32, #tpu.memory_space<vmem>>, vector<1x1x16xf32>
      %27 = vector.shape_cast %26 : vector<1x1x16xf32> to vector<1x16xf32>
      %cst = arith.constant 0.000000e+00 : f32
      %28 = vector.broadcast %cst : f32 to vector<8x16xf32>
      %29 = vector.extract_strided_slice %21 {offsets = [0, 0], sizes = [8, 1], strides = [1, 1]} : vector<8x3xf32> to vector<8x1xf32>
      %30 = vector.extract_strided_slice %23 {offsets = [0, 0], sizes = [1, 16], strides = [1, 1]} : vector<3x16xf32> to vector<1x16xf32>
      %31 = vector.shape_cast %30 : vector<1x16xf32> to vector<16xf32>
      %32 = vector.shape_cast %31 : vector<16xf32> to vector<1x16xf32>
      %33 = vector.broadcast %29 : vector<8x1xf32> to vector<8x16xf32>
      %34 = vector.broadcast %32 : vector<1x16xf32> to vector<8x16xf32>
      %35 = arith.subf %33, %34 : vector<8x16xf32>
      %36 = arith.mulf %35, %35 : vector<8x16xf32>
      %37 = arith.addf %28, %36 : vector<8x16xf32>
      %38 = vector.extract_strided_slice %21 {offsets = [0, 1], sizes = [8, 1], strides = [1, 1]} : vector<8x3xf32> to vector<8x1xf32>
      %39 = vector.extract_strided_slice %23 {offsets = [1, 0], sizes = [1, 16], strides = [1, 1]} : vector<3x16xf32> to vector<1x16xf32>
      %40 = vector.shape_cast %39 : vector<1x16xf32> to vector<16xf32>
      %41 = vector.shape_cast %40 : vector<16xf32> to vector<1x16xf32>
      %42 = vector.broadcast %38 : vector<8x1xf32> to vector<8x16xf32>
      %43 = vector.broadcast %41 : vector<1x16xf32> to vector<8x16xf32>
      %44 = arith.subf %42, %43 : vector<8x16xf32>
      %45 = arith.mulf %44, %44 : vector<8x16xf32>
      %46 = arith.addf %37, %45 : vector<8x16xf32>
      %47 = vector.extract_strided_slice %21 {offsets = [0, 2], sizes = [8, 1], strides = [1, 1]} : vector<8x3xf32> to vector<8x1xf32>
      %48 = vector.extract_strided_slice %23 {offsets = [2, 0], sizes = [1, 16], strides = [1, 1]} : vector<3x16xf32> to vector<1x16xf32>
      %49 = vector.shape_cast %48 : vector<1x16xf32> to vector<16xf32>
      %50 = vector.shape_cast %49 : vector<16xf32> to vector<1x16xf32>
      %51 = vector.broadcast %47 : vector<8x1xf32> to vector<8x16xf32>
      %52 = vector.broadcast %50 : vector<1x16xf32> to vector<8x16xf32>
      %53 = arith.subf %51, %52 : vector<8x16xf32>
      %54 = arith.mulf %53, %53 : vector<8x16xf32>
      %55 = arith.addf %46, %54 : vector<8x16xf32>
      %cst_21 = arith.constant dense<0xFF800000> : vector<8xf32>
      %56 = vector.multi_reduction <maximumf>, %17, %cst_21 [1] : vector<8x16xf32> to vector<8xf32>
      %57 = vector.shape_cast %56 : vector<8xf32> to vector<8x1xf32>
      %cst_22 = arith.constant dense<0xFF800000> : vector<16xf32>
      %58 = vector.multi_reduction <maximumf>, %19, %cst_22 [0] : vector<16x16xf32> to vector<16xf32>
      %59 = vector.shape_cast %58 : vector<16xf32> to vector<1x16xf32>
      %60 = vector.broadcast %57 : vector<8x1xf32> to vector<8x16xf32>
      %61 = arith.subf %17, %60 : vector<8x16xf32>
      %62 = math.exp %61 : vector<8x16xf32>
      %63 = vector.broadcast %59 : vector<1x16xf32> to vector<16x16xf32>
      %64 = arith.subf %19, %63 : vector<16x16xf32>
      %65 = math.exp %64 : vector<16x16xf32>
      %cst_23 = arith.constant dense<0.000000e+00> : vector<8x16xf32>
      %66 = tpu.matmul %62, %65, %cst_23 {dimension_numbers = #tpu.dot_dimension_numbers<[1], [0], [0], [1], [0, 0, 1, 1], [], []>} : vector<8x16xf32>, vector<16x16xf32>, vector<8x16xf32> -> vector<8x16xf32>
      %67 = vector.extract_strided_slice %17 {offsets = [0, 0], sizes = [8, 1], strides = [1, 1]} : vector<8x16xf32> to vector<8x1xf32>
      %68 = vector.extract_strided_slice %19 {offsets = [0, 0], sizes = [1, 16], strides = [1, 1]} : vector<16x16xf32> to vector<1x16xf32>
      %69 = vector.shape_cast %68 : vector<1x16xf32> to vector<16xf32>
      %70 = vector.shape_cast %69 : vector<16xf32> to vector<1x16xf32>
      %71 = vector.broadcast %67 : vector<8x1xf32> to vector<8x16xf32>
      %72 = vector.broadcast %70 : vector<1x16xf32> to vector<8x16xf32>
      %73 = arith.addf %71, %72 : vector<8x16xf32>
      %74 = vector.extract_strided_slice %17 {offsets = [0, 1], sizes = [8, 1], strides = [1, 1]} : vector<8x16xf32> to vector<8x1xf32>
      %75 = vector.extract_strided_slice %19 {offsets = [1, 0], sizes = [1, 16], strides = [1, 1]} : vector<16x16xf32> to vector<1x16xf32>
      %76 = vector.shape_cast %75 : vector<1x16xf32> to vector<16xf32>
      %77 = vector.shape_cast %76 : vector<16xf32> to vector<1x16xf32>
      %78 = vector.broadcast %74 : vector<8x1xf32> to vector<8x16xf32>
      %79 = vector.broadcast %77 : vector<1x16xf32> to vector<8x16xf32>
      %80 = arith.addf %78, %79 : vector<8x16xf32>
      %cst_24 = arith.constant 4.000000e+00 : f32
      %81 = vector.broadcast %cst_24 : f32 to vector<8x16xf32>
      %82 = arith.cmpf ogt, %55, %81 : vector<8x16xf32>
      %83 = arith.select %82, %80, %73 : vector<8x16xi1>, vector<8x16xf32>
      %84 = vector.extract_strided_slice %17 {offsets = [0, 2], sizes = [8, 1], strides = [1, 1]} : vector<8x16xf32> to vector<8x1xf32>
      %85 = vector.extract_strided_slice %19 {offsets = [2, 0], sizes = [1, 16], strides = [1, 1]} : vector<16x16xf32> to vector<1x16xf32>
      %86 = vector.shape_cast %85 : vector<1x16xf32> to vector<16xf32>
      %87 = vector.shape_cast %86 : vector<16xf32> to vector<1x16xf32>
      %88 = vector.broadcast %84 : vector<8x1xf32> to vector<8x16xf32>
      %89 = vector.broadcast %87 : vector<1x16xf32> to vector<8x16xf32>
      %90 = arith.addf %88, %89 : vector<8x16xf32>
      %cst_25 = arith.constant 10.7959194 : f32
      %91 = vector.broadcast %cst_25 : f32 to vector<8x16xf32>
      %92 = arith.cmpf ogt, %55, %91 : vector<8x16xf32>
      %93 = arith.select %92, %90, %83 : vector<8x16xi1>, vector<8x16xf32>
      %94 = vector.extract_strided_slice %17 {offsets = [0, 3], sizes = [8, 1], strides = [1, 1]} : vector<8x16xf32> to vector<8x1xf32>
      %95 = vector.extract_strided_slice %19 {offsets = [3, 0], sizes = [1, 16], strides = [1, 1]} : vector<16x16xf32> to vector<1x16xf32>
      %96 = vector.shape_cast %95 : vector<1x16xf32> to vector<16xf32>
      %97 = vector.shape_cast %96 : vector<16xf32> to vector<1x16xf32>
      %98 = vector.broadcast %94 : vector<8x1xf32> to vector<8x16xf32>
      %99 = vector.broadcast %97 : vector<1x16xf32> to vector<8x16xf32>
      %100 = arith.addf %98, %99 : vector<8x16xf32>
      %cst_26 = arith.constant 20.8979607 : f32
      %101 = vector.broadcast %cst_26 : f32 to vector<8x16xf32>
      %102 = arith.cmpf ogt, %55, %101 : vector<8x16xf32>
      %103 = arith.select %102, %100, %93 : vector<8x16xi1>, vector<8x16xf32>
      %104 = vector.extract_strided_slice %17 {offsets = [0, 4], sizes = [8, 1], strides = [1, 1]} : vector<8x16xf32> to vector<8x1xf32>
      %105 = vector.extract_strided_slice %19 {offsets = [4, 0], sizes = [1, 16], strides = [1, 1]} : vector<16x16xf32> to vector<1x16xf32>
      %106 = vector.shape_cast %105 : vector<1x16xf32> to vector<16xf32>
      %107 = vector.shape_cast %106 : vector<16xf32> to vector<1x16xf32>
      %108 = vector.broadcast %104 : vector<8x1xf32> to vector<8x16xf32>
      %109 = vector.broadcast %107 : vector<1x16xf32> to vector<8x16xf32>
      %110 = arith.addf %108, %109 : vector<8x16xf32>
      %cst_27 = arith.constant 34.3061218 : f32
      %111 = vector.broadcast %cst_27 : f32 to vector<8x16xf32>
      %112 = arith.cmpf ogt, %55, %111 : vector<8x16xf32>
      %113 = arith.select %112, %110, %103 : vector<8x16xi1>, vector<8x16xf32>
      %114 = vector.extract_strided_slice %17 {offsets = [0, 5], sizes = [8, 1], strides = [1, 1]} : vector<8x16xf32> to vector<8x1xf32>
      %115 = vector.extract_strided_slice %19 {offsets = [5, 0], sizes = [1, 16], strides = [1, 1]} : vector<16x16xf32> to vector<1x16xf32>
      %116 = vector.shape_cast %115 : vector<1x16xf32> to vector<16xf32>
      %117 = vector.shape_cast %116 : vector<16xf32> to vector<1x16xf32>
      %118 = vector.broadcast %114 : vector<8x1xf32> to vector<8x16xf32>
      %119 = vector.broadcast %117 : vector<1x16xf32> to vector<8x16xf32>
      %120 = arith.addf %118, %119 : vector<8x16xf32>
      %cst_28 = arith.constant 51.0204086 : f32
      %121 = vector.broadcast %cst_28 : f32 to vector<8x16xf32>
      %122 = arith.cmpf ogt, %55, %121 : vector<8x16xf32>
      %123 = arith.select %122, %120, %113 : vector<8x16xi1>, vector<8x16xf32>
      %124 = vector.extract_strided_slice %17 {offsets = [0, 6], sizes = [8, 1], strides = [1, 1]} : vector<8x16xf32> to vector<8x1xf32>
      %125 = vector.extract_strided_slice %19 {offsets = [6, 0], sizes = [1, 16], strides = [1, 1]} : vector<16x16xf32> to vector<1x16xf32>
      %126 = vector.shape_cast %125 : vector<1x16xf32> to vector<16xf32>
      %127 = vector.shape_cast %126 : vector<16xf32> to vector<1x16xf32>
      %128 = vector.broadcast %124 : vector<8x1xf32> to vector<8x16xf32>
      %129 = vector.broadcast %127 : vector<1x16xf32> to vector<8x16xf32>
      %130 = arith.addf %128, %129 : vector<8x16xf32>
      %cst_29 = arith.constant 71.0408172 : f32
      %131 = vector.broadcast %cst_29 : f32 to vector<8x16xf32>
      %132 = arith.cmpf ogt, %55, %131 : vector<8x16xf32>
      %133 = arith.select %132, %130, %123 : vector<8x16xi1>, vector<8x16xf32>
      %134 = vector.extract_strided_slice %17 {offsets = [0, 7], sizes = [8, 1], strides = [1, 1]} : vector<8x16xf32> to vector<8x1xf32>
      %135 = vector.extract_strided_slice %19 {offsets = [7, 0], sizes = [1, 16], strides = [1, 1]} : vector<16x16xf32> to vector<1x16xf32>
      %136 = vector.shape_cast %135 : vector<1x16xf32> to vector<16xf32>
      %137 = vector.shape_cast %136 : vector<16xf32> to vector<1x16xf32>
      %138 = vector.broadcast %134 : vector<8x1xf32> to vector<8x16xf32>
      %139 = vector.broadcast %137 : vector<1x16xf32> to vector<8x16xf32>
      %140 = arith.addf %138, %139 : vector<8x16xf32>
      %cst_30 = arith.constant 94.3673477 : f32
      %141 = vector.broadcast %cst_30 : f32 to vector<8x16xf32>
      %142 = arith.cmpf ogt, %55, %141 : vector<8x16xf32>
      %143 = arith.select %142, %140, %133 : vector<8x16xi1>, vector<8x16xf32>
      %144 = vector.extract_strided_slice %17 {offsets = [0, 8], sizes = [8, 1], strides = [1, 1]} : vector<8x16xf32> to vector<8x1xf32>
      %145 = vector.extract_strided_slice %19 {offsets = [8, 0], sizes = [1, 16], strides = [1, 1]} : vector<16x16xf32> to vector<1x16xf32>
      %146 = vector.shape_cast %145 : vector<1x16xf32> to vector<16xf32>
      %147 = vector.shape_cast %146 : vector<16xf32> to vector<1x16xf32>
      %148 = vector.broadcast %144 : vector<8x1xf32> to vector<8x16xf32>
      %149 = vector.broadcast %147 : vector<1x16xf32> to vector<8x16xf32>
      %150 = arith.addf %148, %149 : vector<8x16xf32>
      %cst_31 = arith.constant 1.210000e+02 : f32
      %151 = vector.broadcast %cst_31 : f32 to vector<8x16xf32>
      %152 = arith.cmpf ogt, %55, %151 : vector<8x16xf32>
      %153 = arith.select %152, %150, %143 : vector<8x16xi1>, vector<8x16xf32>
      %154 = vector.extract_strided_slice %17 {offsets = [0, 9], sizes = [8, 1], strides = [1, 1]} : vector<8x16xf32> to vector<8x1xf32>
      %155 = vector.extract_strided_slice %19 {offsets = [9, 0], sizes = [1, 16], strides = [1, 1]} : vector<16x16xf32> to vector<1x16xf32>
      %156 = vector.shape_cast %155 : vector<1x16xf32> to vector<16xf32>
      %157 = vector.shape_cast %156 : vector<16xf32> to vector<1x16xf32>
      %158 = vector.broadcast %154 : vector<8x1xf32> to vector<8x16xf32>
      %159 = vector.broadcast %157 : vector<1x16xf32> to vector<8x16xf32>
      %160 = arith.addf %158, %159 : vector<8x16xf32>
      %cst_32 = arith.constant 150.938766 : f32
      %161 = vector.broadcast %cst_32 : f32 to vector<8x16xf32>
      %162 = arith.cmpf ogt, %55, %161 : vector<8x16xf32>
      %163 = arith.select %162, %160, %153 : vector<8x16xi1>, vector<8x16xf32>
      %164 = vector.extract_strided_slice %17 {offsets = [0, 10], sizes = [8, 1], strides = [1, 1]} : vector<8x16xf32> to vector<8x1xf32>
      %165 = vector.extract_strided_slice %19 {offsets = [10, 0], sizes = [1, 16], strides = [1, 1]} : vector<16x16xf32> to vector<1x16xf32>
      %166 = vector.shape_cast %165 : vector<1x16xf32> to vector<16xf32>
      %167 = vector.shape_cast %166 : vector<16xf32> to vector<1x16xf32>
      %168 = vector.broadcast %164 : vector<8x1xf32> to vector<8x16xf32>
      %169 = vector.broadcast %167 : vector<1x16xf32> to vector<8x16xf32>
      %170 = arith.addf %168, %169 : vector<8x16xf32>
      %cst_33 = arith.constant 184.18367 : f32
      %171 = vector.broadcast %cst_33 : f32 to vector<8x16xf32>
      %172 = arith.cmpf ogt, %55, %171 : vector<8x16xf32>
      %173 = arith.select %172, %170, %163 : vector<8x16xi1>, vector<8x16xf32>
      %174 = vector.extract_strided_slice %17 {offsets = [0, 11], sizes = [8, 1], strides = [1, 1]} : vector<8x16xf32> to vector<8x1xf32>
      %175 = vector.extract_strided_slice %19 {offsets = [11, 0], sizes = [1, 16], strides = [1, 1]} : vector<16x16xf32> to vector<1x16xf32>
      %176 = vector.shape_cast %175 : vector<1x16xf32> to vector<16xf32>
      %177 = vector.shape_cast %176 : vector<16xf32> to vector<1x16xf32>
      %178 = vector.broadcast %174 : vector<8x1xf32> to vector<8x16xf32>
      %179 = vector.broadcast %177 : vector<1x16xf32> to vector<8x16xf32>
      %180 = arith.addf %178, %179 : vector<8x16xf32>
      %cst_34 = arith.constant 220.73468 : f32
      %181 = vector.broadcast %cst_34 : f32 to vector<8x16xf32>
      %182 = arith.cmpf ogt, %55, %181 : vector<8x16xf32>
      %183 = arith.select %182, %180, %173 : vector<8x16xi1>, vector<8x16xf32>
      %184 = vector.extract_strided_slice %17 {offsets = [0, 12], sizes = [8, 1], strides = [1, 1]} : vector<8x16xf32> to vector<8x1xf32>
      %185 = vector.extract_strided_slice %19 {offsets = [12, 0], sizes = [1, 16], strides = [1, 1]} : vector<16x16xf32> to vector<1x16xf32>
      %186 = vector.shape_cast %185 : vector<1x16xf32> to vector<16xf32>
      %187 = vector.shape_cast %186 : vector<16xf32> to vector<1x16xf32>
      %188 = vector.broadcast %184 : vector<8x1xf32> to vector<8x16xf32>
      %189 = vector.broadcast %187 : vector<1x16xf32> to vector<8x16xf32>
      %190 = arith.addf %188, %189 : vector<8x16xf32>
      %cst_35 = arith.constant 260.591827 : f32
      %191 = vector.broadcast %cst_35 : f32 to vector<8x16xf32>
      %192 = arith.cmpf ogt, %55, %191 : vector<8x16xf32>
      %193 = arith.select %192, %190, %183 : vector<8x16xi1>, vector<8x16xf32>
      %194 = vector.extract_strided_slice %17 {offsets = [0, 13], sizes = [8, 1], strides = [1, 1]} : vector<8x16xf32> to vector<8x1xf32>
      %195 = vector.extract_strided_slice %19 {offsets = [13, 0], sizes = [1, 16], strides = [1, 1]} : vector<16x16xf32> to vector<1x16xf32>
      %196 = vector.shape_cast %195 : vector<1x16xf32> to vector<16xf32>
      %197 = vector.shape_cast %196 : vector<16xf32> to vector<1x16xf32>
      %198 = vector.broadcast %194 : vector<8x1xf32> to vector<8x16xf32>
      %199 = vector.broadcast %197 : vector<1x16xf32> to vector<8x16xf32>
      %200 = arith.addf %198, %199 : vector<8x16xf32>
      %cst_36 = arith.constant 303.755096 : f32
      %201 = vector.broadcast %cst_36 : f32 to vector<8x16xf32>
      %202 = arith.cmpf ogt, %55, %201 : vector<8x16xf32>
      %203 = arith.select %202, %200, %193 : vector<8x16xi1>, vector<8x16xf32>
      %204 = vector.extract_strided_slice %17 {offsets = [0, 14], sizes = [8, 1], strides = [1, 1]} : vector<8x16xf32> to vector<8x1xf32>
      %205 = vector.extract_strided_slice %19 {offsets = [14, 0], sizes = [1, 16], strides = [1, 1]} : vector<16x16xf32> to vector<1x16xf32>
      %206 = vector.shape_cast %205 : vector<1x16xf32> to vector<16xf32>
      %207 = vector.shape_cast %206 : vector<16xf32> to vector<1x16xf32>
      %208 = vector.broadcast %204 : vector<8x1xf32> to vector<8x16xf32>
      %209 = vector.broadcast %207 : vector<1x16xf32> to vector<8x16xf32>
      %210 = arith.addf %208, %209 : vector<8x16xf32>
      %cst_37 = arith.constant 350.224457 : f32
      %211 = vector.broadcast %cst_37 : f32 to vector<8x16xf32>
      %212 = arith.cmpf ogt, %55, %211 : vector<8x16xf32>
      %213 = arith.select %212, %210, %203 : vector<8x16xi1>, vector<8x16xf32>
      %214 = vector.extract_strided_slice %17 {offsets = [0, 15], sizes = [8, 1], strides = [1, 1]} : vector<8x16xf32> to vector<8x1xf32>
      %215 = vector.extract_strided_slice %19 {offsets = [15, 0], sizes = [1, 16], strides = [1, 1]} : vector<16x16xf32> to vector<1x16xf32>
      %216 = vector.shape_cast %215 : vector<1x16xf32> to vector<16xf32>
      %217 = vector.shape_cast %216 : vector<16xf32> to vector<1x16xf32>
      %218 = vector.broadcast %214 : vector<8x1xf32> to vector<8x16xf32>
      %219 = vector.broadcast %217 : vector<1x16xf32> to vector<8x16xf32>
      %220 = arith.addf %218, %219 : vector<8x16xf32>
      %cst_38 = arith.constant 4.000000e+02 : f32
      %221 = vector.broadcast %cst_38 : f32 to vector<8x16xf32>
      %222 = arith.cmpf ogt, %55, %221 : vector<8x16xf32>
      %223 = arith.select %222, %220, %213 : vector<8x16xi1>, vector<8x16xf32>
      %224 = vector.broadcast %57 : vector<8x1xf32> to vector<8x16xf32>
      %225 = vector.broadcast %59 : vector<1x16xf32> to vector<8x16xf32>
      %226 = arith.addf %224, %225 : vector<8x16xf32>
      %cst_39 = arith.constant 1.000000e-30 : f32
      %227 = vector.broadcast %cst_39 : f32 to vector<8x16xf32>
      %228 = arith.maximumf %66, %227 : vector<8x16xf32>
      %229 = math.log %228 : vector<8x16xf32>
      %230 = arith.addf %226, %229 : vector<8x16xf32>
      %231 = arith.subf %230, %223 : vector<8x16xf32>
      %232 = vector.broadcast %25 : vector<8x1xf32> to vector<8x16xf32>
      %233 = vector.broadcast %27 : vector<1x16xf32> to vector<8x16xf32>
      %234 = arith.mulf %232, %233 : vector<8x16xf32>
      %235 = arith.mulf %231, %234 : vector<8x16xf32>
      %236 = vector.shape_cast %235 : vector<8x16xf32> to vector<1x8x16xf32>
      %cst_40 = arith.constant dense<0.000000e+00> : vector<1xf32>
      %237 = vector.multi_reduction <add>, %236, %cst_40 [1, 2] : vector<1x8x16xf32> to vector<1xf32>
      %238 = vector.shape_cast %237 : vector<1xf32> to vector<1x1x1xf32>
      %239 = vector.extract %238[0, 0, 0] : f32 from vector<1x1x1xf32>
      %c0_41 = arith.constant 0 : index
      %c0_42 = arith.constant 0 : index
      %c0_43 = arith.constant 0 : index
      %c0_44 = arith.constant 0 : index
      %240 = vector.load %arg12[%c0_41, %c0_42, %c0_43, %c0_44] : memref<1x1x8x128xf32, #tpu.memory_space<vmem>>, vector<1x1x8x128xf32>
      %241 = vector.broadcast %239 : f32 to vector<1x1x8x128xf32>
      %242 = arith.addf %240, %241 : vector<1x1x8x128xf32>
      %c0_45 = arith.constant 0 : index
      %c0_46 = arith.constant 0 : index
      %c0_47 = arith.constant 0 : index
      %c0_48 = arith.constant 0 : index
      %243 = vector.load %arg12[%c0_45, %c0_46, %c0_47, %c0_48] : memref<1x1x8x128xf32, #tpu.memory_space<vmem>>, vector<1x1x8x128xf32>
      tpu.vector_store %arg12[%c0_45, %c0_46, %c0_47, %c0_48], %242 {strides = array<i32>} : memref<1x1x8x128xf32, #tpu.memory_space<vmem>>, vector<1x1x8x128xf32>,
    } else {
    }
    return
  }
  func.func @transform_0(%arg0: i32, %arg1: i32, %arg2: i32, %arg3: memref<4xi32, #tpu.memory_space<smem>>, %arg4: memref<2xi32, #tpu.memory_space<smem>>) -> (i32, i32, i32) {
    %c0_i32 = arith.constant 0 : i32
    %c0_i32_0 = arith.constant 0 : i32
    return %arg0, %arg1, %c0_i32 : i32, i32, i32
  }
  func.func @transform_1(%arg0: i32, %arg1: i32, %arg2: i32, %arg3: memref<4xi32, #tpu.memory_space<smem>>, %arg4: memref<2xi32, #tpu.memory_space<smem>>) -> (i32, i32, i32) {
    %c0_i32 = arith.constant 0 : i32
    %c0_i32_0 = arith.constant 0 : i32
    return %arg0, %c0_i32, %arg2 : i32, i32, i32
  }
  func.func @transform_2(%arg0: i32, %arg1: i32, %arg2: i32, %arg3: memref<4xi32, #tpu.memory_space<smem>>, %arg4: memref<2xi32, #tpu.memory_space<smem>>) -> (i32, i32, i32) {
    %c0_i32 = arith.constant 0 : i32
    %c0_i32_0 = arith.constant 0 : i32
    return %arg0, %arg1, %c0_i32 : i32, i32, i32
  }
  func.func @transform_3(%arg0: i32, %arg1: i32, %arg2: i32, %arg3: memref<4xi32, #tpu.memory_space<smem>>, %arg4: memref<2xi32, #tpu.memory_space<smem>>) -> (i32, i32, i32) {
    %c0_i32 = arith.constant 0 : i32
    %c0_i32_0 = arith.constant 0 : i32
    return %arg0, %c0_i32, %arg2 : i32, i32, i32
  }
  func.func @transform_4(%arg0: i32, %arg1: i32, %arg2: i32, %arg3: memref<4xi32, #tpu.memory_space<smem>>, %arg4: memref<2xi32, #tpu.memory_space<smem>>) -> (i32, i32, i32) {
    %c0_i32 = arith.constant 0 : i32
    %c0_i32_0 = arith.constant 0 : i32
    return %arg0, %arg1, %c0_i32 : i32, i32, i32
  }
  func.func @transform_5(%arg0: i32, %arg1: i32, %arg2: i32, %arg3: memref<4xi32, #tpu.memory_space<smem>>, %arg4: memref<2xi32, #tpu.memory_space<smem>>) -> (i32, i32, i32) {
    %c0_i32 = arith.constant 0 : i32
    %c0_i32_0 = arith.constant 0 : i32
    return %arg0, %c0_i32, %arg2 : i32, i32, i32
  }
  func.func @transform_6(%arg0: i32, %arg1: i32, %arg2: i32, %arg3: memref<4xi32, #tpu.memory_space<smem>>, %arg4: memref<2xi32, #tpu.memory_space<smem>>) -> i32 {
    %c0_i32 = arith.constant 0 : i32
    %c0_i32_0 = arith.constant 0 : i32
    return %c0_i32 : i32
  }
  func.func @transform_7(%arg0: i32, %arg1: i32, %arg2: i32, %arg3: memref<4xi32, #tpu.memory_space<smem>>, %arg4: memref<2xi32, #tpu.memory_space<smem>>) -> (i32, i32, i32, i32) {
    %c0_i32 = arith.constant 0 : i32
    %c0_i32_0 = arith.constant 0 : i32
    %c0_i32_1 = arith.constant 0 : i32
    return %arg0, %arg1, %c0_i32, %c0_i32_0 : i32, i32, i32, i32
  }
}

</mosaic_0001>

<bundles_post_ra>
// kernel: tpu_custom_call.1
= control target key start
LH: loop header
LB: loop body
LE: loop exit
PB: predicated region body
PF: predicated region fallthrough
CT: control target
= control target key end

     0   :  { %s1726_s0 = inlined_call_operand.vmem [shape: s32[4], index: 0, kind: input, shape index: {}]   ;;  %s1727_s2 = inlined_call_operand.vmem [shape: f32[2,16,16], index: 2, kind: input, shape index: {}]   ;;  %s1728_s3 = inlined_call_operand.vmem [shape: f32[2,16,16], index: 3, kind: input, shape index: {}]   ;;  %s1729_s4 = inlined_call_operand.vmem [shape: f32[2,16,3], index: 4, kind: input, shape index: {}]   ;;  %s1730_s5 = inlined_call_operand.vmem [shape: f32[2,3,16], index: 5, kind: input, shape index: {}]   ;;  %s1731_s6 = inlined_call_operand.vmem [shape: f32[2,16,1], index: 6, kind: input, shape index: {}]   ;;  %s1732_s7 = inlined_call_operand.vmem [shape: f32[2,1,16], index: 7, kind: input, shape index: {}]   ;;  %s1733_s8 = inlined_call_operand.vmem [shape: f32[15], index: 8, kind: input, shape index: {}]   ;;  %s1734_s9 = inlined_call_operand.hbm [shape: f32[2,2,8,128], index: 9, kind: output, shape index: {}]   ;;  %s1735_s1 = inlined_call_operand.vmem [shape: s32[2], index: 1, kind: input, shape index: {}]  }
   0x1   :  { %1747 = sst [smem:[#allocation21_spill]] %s1728_s3  ;;  %s14_s11 = sshll.u32 %s1726_s0, 4  ;;  %s15_s11 = int_to_ptr.vmem [resolvable:$true] %s14_s11 }
   0x2   :  { %1748 = sst [smem:[#allocation22_spill]] %s1733_s8  ;;  %s18_s14 = sshll.u32 %s1735_s1, 4  ;;  %s19_s14 = int_to_ptr.vmem [resolvable:$true] %s18_s14 }
   0x3   :  { %1749 = sst [smem:[#allocation23_spill]] %s1734_s9  ;;  %s1204_s15 = scalar_lea.vmem %s15_s11, 16 }
   0x4   :  { %p1205_p0 = scmp.ne.s32.totalorder %s15_s11, %s1204_s15  ;;  %p1209_p1 = scmp.lt.s32.totalorder %s15_s11, %s15_s11 }
   0x5   :  { %p1210_p2 = scmp.lt.s32.totalorder %s1204_s15, %s1204_s15 }
   0x7   :  { %p1211_p3 = por %p1210_p2, %p1209_p1 }
   0x9   :  { %p1212_p4 = pnand %p1211_p3, %p1205_p0 }
   0xb   :  { %1215 = shalt.err (!%p1212_p4)  }
   0xc   :  { %s1345_s16 = smov [#allocation3]   ;;  %s1216_s17 = scalar_lea.vmem %s19_s14, 16 }
   0xd   :  { %17 = dma.vmem_to_smem %s15_s11, 16, %s1345_s16, [#allocation2] }
   0xe   :  { %p1217_p5 = scmp.ne.s32.totalorder %s19_s14, %s1216_s17  ;;  %p1221_p6 = scmp.lt.s32.totalorder %s19_s14, %s19_s14 }
   0xf   :  { %p1222_p7 = scmp.lt.s32.totalorder %s1216_s17, %s1216_s17 }
  0x11   :  { %p1223_p8 = por %p1222_p7, %p1221_p6 }
  0x13   :  { %p1224_p9 = pnand %p1223_p8, %p1217_p5 }
  0x15   :  { %1227 = shalt.err (!%p1224_p9)  }
  0x16   :  { %s1346_s0 = smov [#allocation4]  }
  0x17   :  { %21 = dma.vmem_to_smem %s19_s14, 16, %s1346_s0, [#allocation2] }
  0x18   :  { %1303 = dma.done.wait [#allocation2], 32 }
  0x19   :  { %1304 = vsyncadd [#allocation2], 4294967264 }
  0x1a   :  { %23 = sfence }
  0x1b   :  { %24 = vsyncpa [#allocation7], 0 }
  0x1c   :  { %25 = vsyncpa [#allocation6], 0 }
  0x1d   :  { %27 = vsyncpa [#allocation6 + $0x1], 0  ;;  %s1425_s1 = smov 0   ;;  %s1427_s18 = smov 0  }
  0x1e   :  { %s1429_s19 = smov 0   ;;  %s1431_s20 = smov 0  }
  0x1f   :  { %s1433_s21 = smov 0   ;;  %s1435_s22 = smov 0  }
  0x20   :  { %s1437_s23 = smov 0   ;;  %s1439_s24 = smov 0  }
  0x21 LB: > { %1750 = sst [smem:[#allocation12_spill]] %s1315_s1  ;;  %s1031_s25 = sadd.s32 4294967295, %s1343_s24   ;;  %s1343_s24 = sphi %s1439_s24, %s33_s24   ;;  %s1339_s23 = sphi %s1437_s23, %s1776_s23   ;;  %s1335_s22 = sphi %s1435_s22, %s1775_s22   ;;  %s1331_s21 = sphi %s1433_s21, %s1774_s21   ;;  %s1327_s20 = sphi %s1431_s20, %s1779_s20   ;;  %s1323_s19 = sphi %s1429_s19, %s1772_s19   ;;  %s1319_s18 = sphi %s1427_s18, %s1778_s18   ;;  %s1315_s1 = sphi %s1425_s1, %s1777_s1  }
  0x22   : > { %1751 = sst [smem:[#allocation13_spill]] %s1323_s19  ;;  %s1032_s26 = sadd.s32 4294967294, %s1343_s24  }
  0x23   : > { %1752 = sst [smem:[#allocation14_spill]] %s1335_s22  ;;  %s48_s27 = sadd.s32 1, %s1335_s22 }
  0x24   : > { %1753 = sst [smem:[#allocation15_spill]] %s1339_s23  ;;  %s52_s28 = sadd.s32 1, %s1339_s23 }
  0x25   : > { %1754 = sst [smem:[#allocation16_spill]] %s1343_s24  ;;  %p50_p10 = scmp.ge.s32.totalorder %s48_s27, 2 }
  0x26   : > { %s250_s29 = sadd.s32 1, %s1323_s19  ;;  %p260_p11 = scmp.ne.s32.totalorder %s1323_s19, %s1319_s18 }
  0x27   : > { %p261_p12 = scmp.eq.s32.totalorder %s1031_s25, 3  ;;  %s1781_s27 = smov (%p50_p10, %s48_s27), 0 }
  0x28   : > { %1755 = sst [smem:[#allocation17_spill]] %s1781_s27  ;;  %s1783_s28 = smov (!%p50_p10, %s52_s28), %s1339_s23 }
  0x29   : > { %s246_s30 = ssub.s32 %s1335_s22, %s1781_s27  ;;  %p1477_p13 = por %p261_p12, %p260_p11 }
  0x2a   : > { %p54_p0 = scmp.ge.s32.totalorder %s1783_s28, 2  ;;  %p266_p1 = scmp.ne.s32.totalorder %s1319_s18, %s1315_s1 }
  0x2b   : > { %p267_p2 = scmp.eq.s32.totalorder %s1032_s26, 3  ;;  %p1033_p3 = scmp.ge.s32.totalorder %s1343_s24, 1 }
  0x2c   : > { %s1785_s28 = smov (%p54_p0, %s1783_s28), 0  ;;  %p274_p5 = scmp.lt.s32.totalorder %s1343_s24, 5 }
  0x2d   : > { %1757 = sst [smem:[#allocation18_spill]] %s1785_s28  ;;  %p1486_p4 = por %p267_p2, %p266_p1 }
  0x2e   : > { %s245_s12 = ssub.s32 %s1339_s23, %s1785_s28  ;;  %p1493_p6 = pnand %p1033_p3, %p274_p5 }
  0x2f   : > { %s1758_s11 = scalar_select %p1486_p4, 1, 0 }
  0x30   : > { %s247_s13 = sor.u32 %s246_s30, %s245_s12  ;;  %p1497_p8 = scmp.eq.s32.totalorder %s1031_s25, 0 }
  0x31   : > { %1759 = sst [smem:[#allocation19_spill]] %s1758_s11  ;;  %p248_p7 = scmp.eq.s32.totalorder %s247_s13, 0 }
  0x32   : > { %p1078_p9 = pneg %p1493_p6  ;;  %s1762_s8 = sld [smem:[#allocation22_spill]] }
  0x33   : > { %s1507_s26 = scalar_select %p248_p7, %s1323_s19, %s250_s29  }
  0x34   : > { %p1079_p10 = pnand %p1497_p8, %p1078_p9 }
  0x35   : > { %1763 = sst [smem:[#allocation20_spill]] %s1507_s26 }
  0x36   : > { %p1230_p12 = pneg %p1079_p10 }
  0x38   : > { %s287_s0 = sshll.u32 %s1762_s8, 4  ;;  %s288_s0 = int_to_ptr.vmem [resolvable:$true] %s287_s0 }
  0x39   : > { %s1228_s30 = scalar_lea.vmem %s288_s0, 16  ;;  %p1236_p2 = scmp.lt.s32.totalorder %s288_s0, %s288_s0 }
  0x3a   : > { %p1229_p11 = scmp.ne.s32.totalorder %s288_s0, %s1228_s30  ;;  %p1237_p3 = scmp.lt.s32.totalorder %s1228_s30, %s1228_s30 }
  0x3c   : > { %p1231_p0 = pnand %p1230_p12, %p1229_p11  ;;  %p1238_p5 = por %p1237_p3, %p1236_p2 }
  0x3e   : > { %p1232_p1 = pneg %p1231_p0 }
  0x40   : > { %p1239_p4 = pnand %p1238_p5, %p1232_p1 }
  0x42   : > { %1242 = shalt.err (!%p1239_p4)
}
  0x43   : > { %s1347_s25 = smov [#allocation5]   ;;  %363 = sbr.rel (%p1493_p6) target bundleno = 725 (0x2d5), region = 48 }
  0x44   : > { %1081 = dma.vmem_to_smem (!%p1079_p10), %s288_s0, 16, %s1347_s25, [#allocation7]  }
  0x4a   : > { %1306 = dma.done.wait (%p1497_p8), [#allocation7], 16  }
  0x4b   : > { %1308 = vsyncadd (%p1497_p8), [#allocation7], 4294967280 }
  0x4c   : > { %369 = sfence }
  0x4d   : > { %s1736_s29 = sand.u32 1, %s1319_s18   ;;  %p436_p4 = scmp.lt.s32.totalorder %s1331_s21, 1  ;;  %v1348_v0 = vmov 0.0  }
  0x4e   : > { %s1038_s12 = sshll.u32 %s1736_s29, 3  ;;  %p438_p7 = scmp.lt.s32.totalorder %s1327_s20, 1 }
  0x4f   : > { %s1048_s13 = sshll.u32 %s1331_s21, 1  ;;  %s1526_s15 = scalar_lea.vmem [#allocation8], %s1038_s12 }
  0x50   : > { %s1524_s14 = scalar_select %p436_p4, %s1331_s21, 1  ;;  %485 = vst [vmem:[%s1526_s15] sm:$0xff] %v1348_v0 }
  0x51   : > { %s439_s16 = scalar_select %p438_p7, %s1327_s20, 1 }
  0x52   : > { %s1039_s17 = sshll.u32 %s1524_s14, 1  ;;  %s1056_s0 = sshll.u32 %s1524_s14, 4 }
  0x53   : > { %s441_s30 = sadd.s32 %s1039_s17, %s439_s16  ;;  %s1764_s3 = sld [smem:[#allocation21_spill]] }
  0x54   : > { %s1535_s28 = sshll.u32 %s441_s30, 3  ;;  %s1045_s27 = sshll.u32 %s1524_s14, 2 }
  0x55   : > { %s443_s22 = scalar_lea.vmem %s1727_s2, %s1535_s28  ;;  %s459_s11 = scalar_lea.vmem %s1729_s4, %s1535_s28 }
  0x56   : > { %s1549_s17 = scalar_lea.vmem %s1730_s5, %s1045_s27  ;;  %s474_s30 = scalar_lea.vmem %s1731_s6, %s1535_s28 }
  0x57   : > { %s480_s24 = scalar_lea.vmem %s1732_s7, %s1524_s14  ;;  %s1560_s9 = sadd.s32 %s1327_s20, %s1048_s13 }
  0x58   : > { %s488_s23 = sld [smem:[#allocation3 + %s1560_s9]] }
  0x59   : > { %s451_s8 = scalar_lea.vmem %s1764_s3, %s1056_s0  ;;  %s491_s12 = sld [smem:[#allocation4 + %s1331_s21]] }
  0x5e   : > { %p489_p6 = scmp.gt.s32.totalorder %s488_s23, 0 }
  0x5f   : > { %p492_p8 = scmp.gt.s32.totalorder %s491_s12, 0 }
  0x61   : > { %p493_p9 = pnand %p492_p8, %p489_p6 }
  0x62   : > { %v1564_v1 = vld [vmem:[%s443_s22] sm:$0xff] (!%p493_p9)  ;;  %v1568_v3 = vld [vmem:[%s451_s8 + $0x8] sm:$0xff] (!%p493_p9)  ;;  %vm538_vm0 = vcmask (!%p493_p9), 130048   ;;  %v1349_v7 = vmov (!%p493_p9), 1   ;;  %v1350_v10 = vmov (!%p493_p9), 0   ;;  %v1351_v12 = vmov (!%p493_p9), 2  }
  0x63   : > { %496 = sbr.rel (%p493_p9) target bundleno = 699 (0x2bb), region = 60  ;;  %v1566_v2 = vld [vmem:[%s451_s8] sm:$0xff] (!%p493_p9)  ;;  %v539_v4 = vsel (!%p493_p9), %vm538_vm0, %v1564_v1, -inf  ;;  %v543_v6 = vsel (!%p493_p9), %vm538_vm0, %v1568_v3, -inf  ;;  %1177 = vset.pattern.permute.xlu1 (!%p493_p9), %v1349_v7  ;;  %1176 = vset.pattern.permute.xlu0 (!%p493_p9), %v1350_v10  ;;  %v1352_v22 = vmov (!%p493_p9), 0.0|0.0   ;;  %vm1353_vm1 = vmmov (!%p493_p9), 0  }
  0x64   : > { %v542_v5 = vsel (!%p493_p9), %vm538_vm0, %v1566_v2, -inf  ;;  %v500_v8 = vld [vmem:[%s459_s11] sm:$0xff] (!%p493_p9)  ;;  %540 = vmax.xlane.f32.xlu0 (!%p493_p9), %v539_v4  ;;  %1067 = vmatprep.subr.bf16.mxu0 (!%p493_p9), %v1352_v22  ;;  %v1354_v23 = vmov (!%p493_p9), 0.0   ;;  %v1355_v24 = vmov (!%p493_p9), 3   ;;  %v1356_v27 = vmov (!%p493_p9), 4  }
  0x65   : > { %517 = vperm.xlu1 (!%p493_p9), %1177, %v500_v8   ;;  %v544_v9 = vmax.f32 (!%p493_p9), %v542_v5, %v543_v6  ;;  %1064 = vmatprep.mubr.msk.f32.mxu0 (!%p493_p9), %vm1353_vm1, %v1354_v23  ;;  %v1357_v29 = vmov (!%p493_p9), 10   ;;  %v1358_v30 = vmov (!%p493_p9), 5   ;;  %v1359_v31 = vmov (!%p493_p9), 13   ;;  %v502_v33 = vld [vmem:[%s474_s30] sm:$0xff] (!%p493_p9) }
  0x66   : > { %v1360_v32 = vmov (!%p493_p9), 6   ;;  %v1361_v34 = vmov (!%p493_p9), 7   ;;  %v1362_v35 = vmov (!%p493_p9), 8   ;;  %v1363_v36 = vmov (!%p493_p9), 9   ;;  %v501_v54 = vld [vmem:[%s1549_s17] sm:$0x7] (!%p493_p9) }
  0x67   : > { %v545_v11 = vrot.slane (!%p493_p9), %v544_v9, 4  ;;  %v1364_v37 = vmov (!%p493_p9), 11   ;;  %v1365_v38 = vmov (!%p493_p9), 12   ;;  %v1366_v39 = vmov (!%p493_p9), 14  }
  0x68   : > { %v1367_v40 = vmov (!%p493_p9), 15   ;;  %v509_v49 = vlaneseq (!%p493_p9) }
  0x69   : > { %1178 = vset.pattern.permute.xlu1 (!%p493_p9), %v1351_v12  ;;  %v546_v13 = vmax.f32 (!%p493_p9), %v544_v9, %v545_v11 }
  0x6a   : > { %528 = vperm.xlu1 %1178, %v500_v8   ;;  %v1608_v50 = vshrl.u32 %v509_v49, 7 }
  0x6b   : > { %v547_v14 = vrot.slane %v546_v13, 2 }
  0x6c   : > { %v1611_v52 = vsub.s32 1, %v1608_v50  ;;  %v511_v53 = vsub.s32 0, %v1608_v50  ;;  %v1617_v57 = vsub.s32 2, %v1608_v50 }
  0x6d   : > { %v548_v15 = vmax.f32 %v546_v13, %v547_v14 }
  0x6e   : > { %1179 = vset.pattern.permute.xlu1 %v1350_v10  ;;  %v523_v56 = vrot.slane %v501_v54, %v1611_v52  ;;  %v512_v58 = vrot.slane %v501_v54, %v511_v53  ;;  %v534_v61 = vrot.slane %v501_v54, %v1617_v57  ;;  %v650_v9 = vrot.slane %v1566_v2, %v1611_v52 }
  0x6f   : > { %635 = vperm.xlu1 %1179, %v1564_v1   ;;  %v549_v16 = vrot.slane %v548_v15, 1  ;;  %v661_v13 = vrot.slane %v1566_v2, %v1617_v57 }
  0x71   : > { %v1577_v17 = vmax.f32 %v548_v15, %v549_v16  ;;  %v682_v16 = vsub.s32 4, %v1608_v50 }
  0x73   : > { %1180 = vset.pattern.permute.xlu1 %v1349_v7  ;;  %v554_v18 = vsub.f32 %v1566_v2, %v1577_v17  ;;  %v555_v19 = vsub.f32 %v1568_v3, %v1577_v17  ;;  %v683_v23 = vrot.slane %v1566_v2, %v682_v16 }
  0x74   : > { %644 = vperm.xlu1 %1180, %v1564_v1  }
  0x75   : > { %v556_v20 = vmul.f32 1.442695, %v554_v18  ;;  %v558_v21 = vmul.f32 1.442695, %v555_v19 }
  0x77   : > { %1196 = vpow2.f32 %v556_v20 }
  0x78   : > { %1181 = vset.pattern.permute.xlu1 %v1351_v12  ;;  %1198 = vpow2.f32 %v558_v21  ;;  %v671_v12 = vsub.s32 3, %v1608_v50  ;;  %v693_v21 = vsub.s32 5, %v1608_v50 }
  0x79   : > { %655 = vperm.xlu1 %1181, %v1564_v1  }
  0x7a   : > { %506 = vperm.xlu0 %1176, %v500_v8   ;;  %v641_v8 = vrot.slane %v1566_v2, %v511_v53  ;;  %v672_v18 = vrot.slane %v1566_v2, %v671_v12 }
  0x7d   : > { %1182 = vset.pattern.permute.xlu1 %v1355_v24 }
  0x7e   : > { %666 = vperm.xlu1 %1182, %v1564_v1   ;;  %1189 = vset.pattern.permute.xlu0 %v1357_v29 }
  0x7f   : > { %743 = vperm.xlu0 %1189, %v1564_v1  }
  0x81   : > { %v1197_v25 = vpop.eup %1196 }
  0x82   : > { %v1199_v26 = vpop.eup %1198  ;;  %1183 = vset.pattern.permute.xlu1 %v1356_v27  ;;  %v694_v27 = vrot.slane %v1566_v2, %v693_v21 }
  0x83   : > { %677 = vperm.xlu1 %1183, %v1564_v1   ;;  %v1068_v28 = vpack.c.bf16 %v1199_v26, %v1197_v25  ;;  %1192 = vset.pattern.permute.xlu0 %v1359_v31  ;;  %v704_v25 = vsub.s32 6, %v1608_v50 }
  0x84   : > { %776 = vperm.xlu0 %1192, %v1564_v1  }
  0x85   : > { %1069 = vmatpush3.bf16.msra.mxu0 %v1068_v28 }
  0x87   : > { %1184 = vset.pattern.permute.xlu1 %v1358_v30  ;;  %v715_v30 = vsub.s32 7, %v1608_v50  ;;  %v760_v50 = vrot.slane %v1568_v3, %v671_v12 }
  0x88   : > { %688 = vperm.xlu1 %1184, %v1564_v1   ;;  %1195 = vset.pattern.permute.xlu0 %v1350_v10 }
  0x89   : > { %816 = vperm.xlu0 %1195, %v502_v33  }
  0x8c   : > { %1185 = vset.pattern.permute.xlu1 %v1360_v32  ;;  %v705_v32 = vrot.slane %v1566_v2, %v704_v25 }
  0x8d   : > { %699 = vperm.xlu1 %1185, %v1564_v1  }
  0x91   : > { %1186 = vset.pattern.permute.xlu1 %v1361_v34 }
  0x92   : > { %710 = vperm.xlu1 %1186, %v1564_v1  }
  0x96   : > { %1187 = vset.pattern.permute.xlu1 %v1362_v35  ;;  %v716_v35 = vrot.slane %v1566_v2, %v715_v30  ;;  %v749_v2 = vrot.slane %v1568_v3, %v1617_v57 }
  0x97   : > { %721 = vperm.xlu1 %1187, %v1564_v1  }
  0x9b   : > { %1188 = vset.pattern.permute.xlu1 %v1363_v36 }
  0x9c   : > { %732 = vperm.xlu1 %1188, %v1564_v1  }
  0xa0   : > { %1190 = vset.pattern.permute.xlu1 %v1364_v37 }
  0xa1   : > { %754 = vperm.xlu1 %1190, %v1564_v1  }
  0xa5   : > { %1191 = vset.pattern.permute.xlu1 %v1365_v38 }
  0xa6   : > { %765 = vperm.xlu1 %1191, %v1564_v1  }
  0xaa   : > { %1193 = vset.pattern.permute.xlu1 %v1366_v39  ;;  %v727_v39 = vrot.slane %v1568_v3, %v511_v53 }
  0xab   : > { %787 = vperm.xlu1 %1193, %v1564_v1  }
  0xaf   : > { %1194 = vset.pattern.permute.xlu1 %v1367_v40 }
  0xb0   : > { %798 = vperm.xlu1 %1194, %v1564_v1  }
  0xe4   : > { %v518_v45 = vpop.permute.xlu1 %517 }
  0xe5   : > { %v524_v60 = vsub.f32 %v518_v45, %v523_v56 }
  0xe7   : > { %v525_v0 = vmul.f32 %v524_v60, %v524_v60  ;;  %v782_v60 = vrot.slane %v1568_v3, %v693_v21 }
  0xe9   : > { %v529_v46 = vpop.permute.xlu1 %528 }
  0xee   : > { %v636_v47 = vpop.permute.xlu1 %635 }
  0xef   : > { %v642_v14 = vadd.f32 %v641_v8, %v636_v47 }
  0xf1   : > { %v1603_v41 = vpop.xlane.xlu0 %540 }
  0xf2   : > { %v551_v42 = vsub.f32 %v1564_v1, %v1603_v41  ;;  %v535_v1 = vsub.f32 %v529_v46, %v534_v61 }
  0xf3   : > { %v645_v48 = vpop.permute.xlu1 %644 }
  0xf4   : > { %v552_v43 = vmul.f32 1.442695, %v551_v42  ;;  %v536_v6 = vmul.f32 %v535_v1, %v535_v1  ;;  %v651_v15 = vadd.f32 %v650_v9, %v645_v48  ;;  %v793_v1 = vrot.slane %v1568_v3, %v704_v25 }
  0xf6   : > { %1200 = vpow2.f32 %v552_v43  ;;  %v738_v43 = vrot.slane %v1568_v3, %v1611_v52  ;;  %v771_v52 = vrot.slane %v1568_v3, %v682_v16 }
  0xf8   : > { %v656_v51 = vpop.permute.xlu1 %655 }
  0xf9   : > { %v507_v59 = vpop.permute.xlu0 %506  ;;  %v662_v19 = vadd.f32 %v661_v13, %v656_v51  ;;  %v1050_v13 = vld [vmem:[%s480_s24] ss:$0 sm:$0xff] }
  0xfa   : > { %v513_v63 = vsub.f32 %v507_v59, %v512_v58 }
  0xfc   : > { %v514_v4 = vmul.f32 %v513_v63, %v513_v63 }
  0xfd   : > { %v667_v55 = vpop.permute.xlu1 %666 }
  0xfe   : > { %v526_v7 = vadd.f32 %v525_v0, %v514_v4  ;;  %v673_v24 = vadd.f32 %v672_v18, %v667_v55  ;;  %v744_v48 = vpop.permute.xlu0 %743 }
  0xff   : > { %v750_v53 = vadd.f32 %v749_v2, %v744_v48 }
 0x100   : > { %v1201_v44 = vpop.eup %1200  ;;  %v1623_v11 = vadd.f32 %v536_v6, %v526_v7  ;;  %v804_v6 = vrot.slane %v1568_v3, %v715_v30 }
 0x101   : > { %1065 = vmatmul.mubr.msk.f32.vlgmr.msra.gmra.mrb[0].mxu0 %vm538_vm0, %v1201_v44 }
 0x102   : > { %v678_v62 = vpop.permute.xlu1 %677  ;;  %vm652_vm2 = vcmp.gt.f32.partialorder %v1623_v11, 4.0  ;;  %vm663_vm3 = vcmp.gt.f32.partialorder %v1623_v11, 10.795919  ;;  %vm674_vm4 = vcmp.gt.f32.partialorder %v1623_v11, 20.89796  ;;  %vm729_vm9 = vcmp.gt.f32.partialorder %v1623_v11, 121.0 }
 0x103   : > { %v653_v22 = vsel %vm652_vm2, %v651_v15, %v642_v14  ;;  %v684_v28 = vadd.f32 %v683_v23, %v678_v62  ;;  %vm685_vm5 = vcmp.gt.f32.partialorder %v1623_v11, 34.30612  ;;  %vm696_vm6 = vcmp.gt.f32.partialorder %v1623_v11, 51.02041  ;;  %v777_v63 = vpop.permute.xlu0 %776 }
 0x104   : > { %v664_v26 = vsel %vm663_vm3, %v662_v19, %v653_v22  ;;  %vm707_vm7 = vcmp.gt.f32.partialorder %v1623_v11, 71.04082  ;;  %vm718_vm8 = vcmp.gt.f32.partialorder %v1623_v11, 94.36735  ;;  %vm740_vm10 = vcmp.gt.f32.partialorder %v1623_v11, 150.93877 }
 0x105   : > { %v675_v31 = vsel %vm674_vm4, %v673_v24, %v664_v26  ;;  %vm751_vm11 = vcmp.gt.f32.partialorder %v1623_v11, 184.18367  ;;  %vm762_vm12 = vcmp.gt.f32.partialorder %v1623_v11, 220.73468  ;;  %vm773_vm13 = vcmp.gt.f32.partialorder %v1623_v11, 260.59183 }
 0x106   : > { %v686_v34 = vsel %vm685_vm5, %v684_v28, %v675_v31  ;;  %v783_v4 = vadd.f32 %v782_v60, %v777_v63  ;;  %vm784_vm14 = vcmp.gt.f32.partialorder %v1623_v11, 303.7551  ;;  %vm795_vm15 = vcmp.gt.f32.partialorder %v1623_v11, 350.22446 }
 0x107   : > { %v689_v5 = vpop.permute.xlu1 %688  ;;  %v808_v15 = vadd.f32 %v1577_v17, %v1603_v41  ;;  %vm806_vm1 = vcmp.gt.f32.partialorder %v1623_v11, 400.0  ;;  %v837_v11 = vld [vmem:[%s1526_s15] sm:$0xff] }
 0x108   : > { %v695_v33 = vadd.f32 %v694_v27, %v689_v5  ;;  %v817_v14 = vpop.permute.xlu0 %816 }
 0x109   : > { %v825_v19 = vmul.f32 %v1050_v13, %v817_v14 }
 0x10a   : > { %v697_v38 = vsel %vm696_vm6, %v695_v33, %v686_v34 }
 0x10c   : > { %v700_v10 = vpop.permute.xlu1 %699 }
 0x10d   : > { %v706_v36 = vadd.f32 %v705_v32, %v700_v10 }
 0x10f   : > { %v708_v42 = vsel %vm707_vm7, %v706_v36, %v697_v38 }
 0x111   : > { %v711_v20 = vpop.permute.xlu1 %710 }
 0x112   : > { %v717_v40 = vadd.f32 %v716_v35, %v711_v20 }
 0x114   : > { %v719_v46 = vsel %vm718_vm8, %v717_v40, %v708_v42 }
 0x116   : > { %v722_v29 = vpop.permute.xlu1 %721 }
 0x117   : > { %v728_v44 = vadd.f32 %v727_v39, %v722_v29 }
 0x119   : > { %v730_v49 = vsel %vm729_vm9, %v728_v44, %v719_v46 }
 0x11b   : > { %v733_v37 = vpop.permute.xlu1 %732 }
 0x11c   : > { %v739_v47 = vadd.f32 %v738_v43, %v733_v37 }
 0x11e   : > { %v741_v54 = vsel %vm740_vm10, %v739_v47, %v730_v49 }
 0x11f   : > { %v752_v57 = vsel %vm751_vm11, %v750_v53, %v741_v54 }
 0x120   : > { %v755_v45 = vpop.permute.xlu1 %754 }
 0x121   : > { %v761_v56 = vadd.f32 %v760_v50, %v755_v45 }
 0x123   : > { %v763_v0 = vsel %vm762_vm12, %v761_v56, %v752_v57 }
 0x125   : > { %v766_v51 = vpop.permute.xlu1 %765 }
 0x126   : > { %v772_v61 = vadd.f32 %v771_v52, %v766_v51 }
 0x128   : > { %v774_v5 = vsel %vm773_vm13, %v772_v61, %v763_v0 }
 0x129   : > { %v785_v9 = vsel %vm784_vm14, %v783_v4, %v774_v5 }
 0x12a   : > { %v788_v62 = vpop.permute.xlu1 %787 }
 0x12b   : > { %v794_v7 = vadd.f32 %v793_v1, %v788_v62 }
 0x12d   : > { %v796_v16 = vsel %vm795_vm15, %v794_v7, %v785_v9 }
 0x12f   : > { %v799_v8 = vpop.permute.xlu1 %798 }
 0x130   : > { %v805_v12 = vadd.f32 %v804_v6, %v799_v8 }
 0x132   : > { %v807_v20 = vsel %vm806_vm1, %v805_v12, %v796_v16 }
 0x1d4   : > { %v629_v55 = vpop.f32.mrb[0].mxu0 }
 0x1d5   : > { %v809_v58 = vmax.f32 %v629_v55, 1e-30  ;;  %v1066_v59 = vpop.f32.mrb[1].mxu0 }
 0x1d7   : > { %1202 = vlog2.f32 %v809_v58 }
 0x1e1   : > { %v1203_v10 = vpop.eup %1202 }
 0x1e2   : > { %v811_v3 = vmul.f32 0.6931472, %v1203_v10 }
 0x1e4   : > { %v812_v18 = vadd.f32 %v811_v3, %v808_v15 }
 0x1e6   : > { %v813_v21 = vsub.f32 %v812_v18, %v807_v20 }
 0x1e8   : > { %v826_v22 = vmul.f32 %v825_v19, %v813_v21 }
 0x1ea   : > { %v827_v23 = vsel %vm538_vm0, %v826_v22, 0.0 }
 0x1eb   : > { %828 = vadd.xlane.f32.xlu1 %v827_v23 }
 0x278   : > { %v829_v24 = vpop.xlane.xlu1 %828 }
 0x279   : > { %v830_v25 = vrot.slane %v829_v24, 4 }
 0x27b   : > { %v831_v26 = vadd.f32 %v830_v25, %v829_v24 }
 0x27d   : > { %v832_v27 = vrot.slane %v831_v26, 2 }
 0x27f   : > { %v833_v28 = vadd.f32 %v832_v27, %v831_v26 }
 0x281   : > { %v834_v17 = vrot.slane %v833_v28, 1 }
 0x283   : > { %v835_v41 = vadd.f32 %v834_v17, %v833_v28 }
 0x285   : > { %1070 = vpush %v835_v41 }
 0x2b6   : > { %s1071_s20 = spop %1070 }
 0x2b7   : > { %v838_v29 = vstv %s1071_s20 }
 0x2b8   : > { %v839_v30 = vadd.f32 %v838_v29, %v837_v11 }
 0x2ba   : > { %840 = vst [vmem:[%s1526_s15] sm:$0xff] %v839_v30 }
 0x2bb PF: > { %s1053_s21 = sshll.u32 %s1560_s9, 7  ;;  %s1765_s27 = sld [smem:[#allocation23_spill]] }
 0x2bc   : > { %s857_s11 = sshll.u32 %s1526_s15, 4  ;;  %s1766_s26 = sand.u32 1, %s1319_s18   ;;  %s858_s11 = int_to_ptr.vmem [resolvable:$true] %s857_s11 }
 0x2bd   : > { %s842_s13 = scalar_lea.sflag [#allocation6], %s1766_s26  ;;  %s1243_s14 = scalar_lea.vmem %s858_s11, 128 }
 0x2be   : > { %p1244_p10 = scmp.ne.s32.totalorder %s858_s11, %s1243_s14  ;;  %s1368_s16 = smov [#allocation8]  }
 0x2bf   : > { %s1247_s17 = sshll.u32 %s1368_s16, 4  ;;  %s1248_s17 = int_to_ptr.vmem [resolvable:$false] %s1247_s17 }
 0x2c0   : > { %p1245_p11 = pnand %p1244_p10, %p1477_p13  ;;  %s1249_s29 = scalar_lea.vmem %s1248_s17, 256 }
 0x2c1   : > { %s1676_s28 = scalar_lea.hbm %s1765_s27, %s1053_s21  ;;  %p1250_p0 = scmp.lt.s32.totalorder %s858_s11, %s1248_s17 }
 0x2c2   : > { %p1246_p12 = pneg %p1245_p11  ;;  %p1251_p1 = scmp.lt.s32.totalorder %s1249_s29, %s1243_s14 }
 0x2c4   : > { %p1252_p2 = por %p1251_p1, %p1250_p0 }
 0x2c6   : > { %p1253_p3 = pnand %p1252_p2, %p1246_p12 }
 0x2c8   : > { %1256 = shalt.err (!%p1253_p3)
}
 0x2c9   : > { %s1257_s9 = scalar_lea.hbm %s1676_s28, 128  ;;  %s1261_s30 = scalar_lea.hbm %s1765_s27, 512 }
 0x2ca   : > { %p1258_p5 = scmp.ne.s32.totalorder %s1676_s28, %s1257_s9  ;;  %p1262_p6 = scmp.lt.u32.totalorder %s1676_s28, %s1765_s27 }
 0x2cb   : > { %p1263_p8 = scmp.lt.u32.totalorder %s1261_s30, %s1257_s9  ;;  %p1265_p10 = scmp.lt.u32.totalorder %s1257_s9, %s1676_s28 }
 0x2cc   : > { %p1259_p4 = pnand %p1258_p5, %p1477_p13 }
 0x2cd   : > { %p1264_p9 = por %p1263_p8, %p1262_p6 }
 0x2ce   : > { %p1260_p7 = pneg %p1259_p4 }
 0x2cf   : > { %p1266_p11 = por %p1265_p10, %p1264_p9 }
 0x2d1   : > { %p1267_p12 = pnand %p1266_p11, %p1260_p7 }
 0x2d3   : > { %1270 = shalt.err (!%p1267_p12)
}
 0x2d4   : > { %1076 = dma.vmem_to_hbm [thread:$0]  (%p1477_p13), %s858_s11, 128, %s1676_s28, %s842_s13  }
 0x2d5 PF: > { %s1767_s12 = sld [smem:[#allocation16_spill]]  ;;  %s1768_s3 = sld [smem:[#allocation12_spill]] }
 0x2d6   : > { %s1769_s8 = sld [smem:[#allocation19_spill]] }
 0x2db   : > { %p1088_p0 = scmp.ge.s32.totalorder %s1767_s12, 2  ;;  %s869_s1 = sand.u32 1, %s1768_s3  }
 0x2dc   : > { %p1770_p1 = scmp.ne.s32.totalorder %s1769_s8, 0  ;;  %s870_s19 = scalar_lea.sflag [#allocation6], %s869_s1 }
 0x2de   : > { %p1083_p2 = pnand %p1088_p0, %p1770_p1 }
 0x2e0   : > { %1310 = dma.done.wait (!%p1083_p2), %s870_s19, 128  }
 0x2e1   : > { %1312 = vsyncadd (!%p1083_p2), %s870_s19, 4294967168  ;;  %s33_s24 = sadd.s32 1, %s1767_s12   ;;  %s1771_s20 = sld [smem:[#allocation13_spill]] }
 0x2e2   : > { %p30_p3 = scmp.ge.s32.totalorder %s33_s24, 6   ;;  %s1772_s19 = sld [smem:[#allocation20_spill]] }
 0x2e3   : > { %s1773_s10 = sld [smem:[#allocation14_spill]]  ;;  %s1774_s21 = sld [smem:[#allocation15_spill]] }
 0x2e4   : > { %s1775_s22 = sld [smem:[#allocation17_spill]]  ;;  %s1776_s23 = sld [smem:[#allocation18_spill]] }
 0x2e5   : > { %s1777_s1 = smov %s1319_s18  ;;  %32 = sbr.rel (!%p30_p3) target bundleno = 33 (0x21), region = 111 }
 0x2e7   : > { %s1778_s18 = smov %s1771_s20 }
 0x2e9   : > { %s1779_s20 = smov %s1773_s10 }
 0x2ec   :  { %875 = vsyncpa [#allocation6], 1 }
 0x2ed   :  { %877 = vsyncpa [#allocation6 + $0x1], 1 }
 0x2ee   :  { %878 = vsyncpa [#allocation7], 1 }
 0x2ef   :  { %880 = vsyncpa [#allocation7 + $0x1], 1 }

</bundles_post_ra>
